<compile_context>
chip_gen: v7x
topology: tpu7x:2x2x1
jax: 0.10.0
libtpu: 0.0.40
codegen_flags: <defaults>
</compile_context>

<pallas_src>
import functools

import jax
import jax.numpy as jnp
from jax.experimental import pallas as pl
from jax.experimental.pallas import tpu as pltpu

_LANE = 128
# Bound on the statically unrolled copy loop inside the kernel.
_UNROLL_CAP = 512


def _vmem_capacity_bytes() -> int:
    """Per-TensorCore VMEM for planning, clamped to the v7x floor (64 MiB)."""
    try:
        cap = int(pltpu.get_tpu_info().vmem_capacity_bytes)
    except Exception:
        cap = 64 * 1024 * 1024
    # get_tpu_info() may report chip-level capacity on multi-core parts; plan
    # against the smallest per-core figure across supported generations
    # (v7x: 64 MiB / TC) so tiles and the scoped-VMEM limit are always safe.
    return min(cap, 64 * 1024 * 1024)


def _choose_tile_l(c: int, l: int, itemsize: int, budget: int,
                   target_tile_bytes: int = 1 << 20) -> int:
    """Pick the lane-tile size for this mem-bound copy kernel.

      * cap the tile at ~1 MiB (>=512 lanes already ~85% of HBM roofline;
        bigger tiles only reduce the number of overlapping pipeline steps),
      * stay within the double-buffer VMEM budget (2 input + 2 output bufs),
      * prefer a multiple of 128 that divides L exactly (unmasked lane-dense
        stores, full-size edge DMAs); fall back to a ragged last tile.
    """
    max_by_budget = budget // (4 * c * itemsize)
    max_by_target = max(target_tile_bytes // (c * itemsize), 4 * _LANE)
    cap = max((min(max_by_budget, max_by_target) // _LANE) * _LANE, _LANE)
    if l <= cap:
        return l                                   # full-L tile (always legal)
    for t in range(cap, 0, -_LANE):                # exact-divisor preference
        if l % t == 0:
            return t
    return cap                                     # ragged last tile (masked)


def _seq_shuffle_kernel(x_ref, o_ref, *, g: int, cpg: int):
    # x_ref / o_ref: (C, TILE_L) VMEM tiles (batch dim squeezed by BlockSpec).
    # Grouped channel transpose: out[a*g + j, :] = x[j*cpg + a, :].
    if g == 1 or cpg == 1:
        o_ref[...] = x_ref[...]                    # identity permutation
        return
    if cpg <= g or cpg <= _UNROLL_CAP:
        # Loop over cpg: sublane-strided multi-row loads (plentiful vld slots)
        # feeding contiguous multi-row stores (keeps the scarce vst slot fed
        # with full stores, esp. on v5e).  Pure data movement: no reshape /
        # transpose, so no XLU work and no extra VMEM copies.
        for a in range(cpg):
            o_ref[pl.ds(a * g, g), :] = x_ref[pl.ds(a, g, stride=cpg), :]
    else:
        # g < cpg and cpg is very large: bound the static unroll by looping
        # over g instead (contiguous multi-row loads, sublane-strided stores).
        # Only reached for extreme channel counts (cpg > _UNROLL_CAP).
        for j in range(g):
            o_ref[pl.ds(j, cpg, stride=g), :] = x_ref[pl.ds(j * cpg, cpg), :]


def seq_shuffle(x: jax.Array, g: int, *, tile_l: int | None = None) -> jax.Array:
    """Pallas TPU implementation of SeqShuffleUnit.forward.

    Args:
      x: (B, C, L) array, C divisible by g.
      g: number of groups.
      tile_l: optional lane-tile override (full L or a multiple of 128),
              expressed in packed (32-bit container) elements for sub-32-bit
              dtypes.
    Returns:
      (B, C, L) array with channels shuffled by grouped transposition.
    """
    b, c, l = x.shape
    assert c % g == 0, "channels must be divisible by g"
    cpg = c // g
    orig_dtype = x.dtype
    orig_l = l

    # Sub-32-bit dtypes: pack pairs/quads of adjacent L elements into 32-bit
    # containers in the wrapper (pure bitcast of the same bytes; the shuffle
    # only permutes C).  Keeps every channel row one sublane wide -> no
    # packed-sublane unpack work in the kernel and wider DMA bursts.
    itemsize = jnp.dtype(orig_dtype).itemsize
    packed = itemsize < 4
    if packed:
        ratio = 4 // itemsize
        pad = (-l) % ratio
        if pad:
            x = jnp.pad(x, ((0, 0), (0, 0), (0, pad)))
        x = jax.lax.bitcast_convert_type(
            x.reshape(b, c, (l + pad) // ratio, ratio), jnp.uint32)
        l = (l + pad) // ratio
        itemsize = 4

    vmem_cap = _vmem_capacity_bytes()
    budget = vmem_cap // 4                 # <= 16 MiB for the 4 double-buffers
    if tile_l is None:
        tile_l = _choose_tile_l(c, l, itemsize, budget)
    assert tile_l == l or tile_l % _LANE == 0, (
        "tile_l must equal L or be a multiple of 128")

    grid = (b, pl.cdiv(l, tile_l))
    kernel = functools.partial(_seq_shuffle_kernel, g=g, cpg=cpg)

    # Scoped-VMEM limit: comfortably above the pipelined footprint, but never
    # more than 7/8 of the conservative per-core capacity (headroom for Mosaic
    # internal scratch / semaphores on every generation).
    footprint = 4 * c * tile_l * itemsize
    vmem_limit = int(min(vmem_cap * 7 // 8,
                         max(vmem_cap // 2, footprint + (4 << 20))))

    out = pl.pallas_call(
        kernel,
        out_shape=jax.ShapeDtypeStruct((b, c, l), x.dtype),
        grid_spec=pltpu.PrefetchScalarGridSpec(
            num_scalar_prefetch=0,
            grid=grid,
            # Batch dim squeezed (None); C kept whole (it is the permuted axis
            # and equals the full array dim, satisfying the tiling rule for
            # any C); L tiled lane-dense.
            in_specs=[pl.BlockSpec((None, c, tile_l), lambda i, j: (i, 0, j))],
            out_specs=pl.BlockSpec((None, c, tile_l), lambda i, j: (i, 0, j)),
        ),
        compiler_params=pltpu.CompilerParams(
            # Both grid axes are fully independent -> eligible for megacore
            # sharding; harmless no-op on single-core parts.
            dimension_semantics=("parallel", "parallel"),
            vmem_limit_bytes=vmem_limit,
        ),
        cost_estimate=pl.CostEstimate(
            flops=0, transcendentals=0,
            bytes_accessed=2 * b * c * l * itemsize),
    )(x)

    if packed:
        out = jax.lax.bitcast_convert_type(out, orig_dtype)
        out = out.reshape(b, c, -1)[:, :, :orig_l]
    return out


def seq_shuffle_ref(x: jax.Array, g: int) -> jax.Array:
    """Pure-JAX reference (ShuffleNet channel shuffle on (B, C, L))."""
    b, c, l = x.shape
    return x.reshape(b, g, c // g, l).transpose(0, 2, 1, 3).reshape(b, c, l)


if __name__ == "__main__":
    key = jax.random.PRNGKey(0)
    k1, k2, k3, k4 = jax.random.split(key, 4)

    # Case 1: small f32 shapes, default tile selection (single full-L tile).
    x1 = jax.random.normal(k1, (2, 8, 128), dtype=jnp.float32)
    out1 = jax.block_until_ready(seq_shuffle(x1, 4))
    ref1 = seq_shuffle_ref(x1, 4)
    assert out1.shape == ref1.shape and out1.dtype == ref1.dtype
    assert jnp.array_equal(out1, ref1), "case 1: Pallas shuffle mismatch"

    # Case 2: exercise the tiled L pipeline (3 lane tiles of 128) with
    # cpg == g == 4 (strided-load / contiguous-store branch).
    x2 = jax.random.normal(k2, (2, 16, 384), dtype=jnp.float32)
    out2 = jax.block_until_ready(seq_shuffle(x2, 4, tile_l=128))
    assert jnp.array_equal(out2, seq_shuffle_ref(x2, 4)), "case 2: mismatch"

    # Case 3: bf16 input exercises the 32-bit container path (the kernel runs
    # on a (2, 16, 128) uint32 view) with cpg > g loop ordering.
    x3 = jax.random.normal(k3, (2, 16, 256), dtype=jnp.bfloat16)
    out3 = jax.block_until_ready(seq_shuffle(x3, 2))
    assert out3.shape == x3.shape and out3.dtype == jnp.bfloat16
    assert jnp.array_equal(out3, seq_shuffle_ref(x3, 2)), "case 3: mismatch"

    # Case 4: g == 1 identity fast path.
    x4 = jax.random.normal(k4, (1, 4, 128), dtype=jnp.float32)
    out4 = jax.block_until_ready(seq_shuffle(x4, 1))
    assert jnp.array_equal(out4, x4), "case 4: mismatch"

    print("KERNEL_OK")
</pallas_src>

<mosaic_0001>
module attributes {stable_mosaic.version = 11 : i64} {
  func.func @_seq_shuffle_kernel(%arg0: i32, %arg1: i32, %arg2: memref<1x8x128xf32, #tpu.memory_space<vmem>>, %arg3: memref<1x8x128xf32, #tpu.memory_space<vmem>>) attributes {dimension_semantics = [#tpu.dimension_semantics<parallel>, #tpu.dimension_semantics<parallel>], iteration_bounds = array<i64: 2, 1>, scalar_prefetch = 0 : i64, scratch_operands = 0 : i64, tpu.core_type = #tpu.core_type<tc>, window_params = [{transform_indices = @transform_0, window_bounds = array<i64: 1, 8, 128>}, {transform_indices = @transform_1, window_bounds = array<i64: 1, 8, 128>}]} {
    %c0 = arith.constant 0 : index
    %c0_0 = arith.constant 0 : index
    %c0_1 = arith.constant 0 : index
    %0 = tpu.strided_load %arg2[%c0, %c0_0, %c0_1] {strides = array<i32: 1, 2, 1>} : memref<1x8x128xf32, #tpu.memory_space<vmem>>, vector<1x4x128xf32>
    %1 = vector.shape_cast %0 : vector<1x4x128xf32> to vector<4x128xf32>
    %c0_2 = arith.constant 0 : index
    %c0_3 = arith.constant 0 : index
    %c0_4 = arith.constant 0 : index
    %2 = vector.load %arg3[%c0_2, %c0_3, %c0_4] : memref<1x8x128xf32, #tpu.memory_space<vmem>>, vector<1x4x128xf32>
    %3 = vector.shape_cast %2 : vector<1x4x128xf32> to vector<4x128xf32>
    %4 = vector.shape_cast %1 : vector<4x128xf32> to vector<1x4x128xf32>
    tpu.vector_store %arg3[%c0_2, %c0_3, %c0_4], %4 {strides = array<i32>} : memref<1x8x128xf32, #tpu.memory_space<vmem>>, vector<1x4x128xf32>,
    %c0_5 = arith.constant 0 : index
    %c1 = arith.constant 1 : index
    %c0_6 = arith.constant 0 : index
    %5 = tpu.strided_load %arg2[%c0_5, %c1, %c0_6] {strides = array<i32: 1, 2, 1>} : memref<1x8x128xf32, #tpu.memory_space<vmem>>, vector<1x4x128xf32>
    %6 = vector.shape_cast %5 : vector<1x4x128xf32> to vector<4x128xf32>
    %c0_7 = arith.constant 0 : index
    %c4 = arith.constant 4 : index
    %c0_8 = arith.constant 0 : index
    %7 = vector.load %arg3[%c0_7, %c4, %c0_8] : memref<1x8x128xf32, #tpu.memory_space<vmem>>, vector<1x4x128xf32>
    %8 = vector.shape_cast %7 : vector<1x4x128xf32> to vector<4x128xf32>
    %9 = vector.shape_cast %6 : vector<4x128xf32> to vector<1x4x128xf32>
    tpu.vector_store %arg3[%c0_7, %c4, %c0_8], %9 {strides = array<i32>} : memref<1x8x128xf32, #tpu.memory_space<vmem>>, vector<1x4x128xf32>,
    return
  }
  func.func @transform_0(%arg0: i32, %arg1: i32) -> (i32, i32, i32) {
    %c0_i32 = arith.constant 0 : i32
    %c0_i32_0 = arith.constant 0 : i32
    return %arg0, %c0_i32, %arg1 : i32, i32, i32
  }
  func.func @transform_1(%arg0: i32, %arg1: i32) -> (i32, i32, i32) {
    %c0_i32 = arith.constant 0 : i32
    %c0_i32_0 = arith.constant 0 : i32
    return %arg0, %c0_i32, %arg1 : i32, i32, i32
  }
}

</mosaic_0001>

<bundles_post_ra>
// kernel: tpu_custom_call.1
= control target key start
LH: loop header
LB: loop body
LE: loop exit
PB: predicated region body
PF: predicated region fallthrough
CT: control target
= control target key end

     0   :  { %6 = vsyncpa [#allocation3], 0  ;;  %s623_s0 = inlined_call_operand.hbm [shape: f32[2,8,128], index: 0, kind: input, shape index: {}]   ;;  %s624_s1 = inlined_call_operand.hbm [shape: f32[2,8,128], index: 1, kind: output, shape index: {}]  }
   0x1   :  { %8 = vsyncpa [#allocation3 + $0x1], 0 }
   0x2   :  { %9 = vsyncpa [#allocation4], 0 }
   0x3   :  { %11 = vsyncpa [#allocation4 + $0x1], 0  ;;  %s451_s6 = smov 0   ;;  %s453_s7 = smov 0  }
   0x4   :  { %s455_s8 = smov 0   ;;  %s457_s9 = smov 0  }
   0x5   :  { %s459_s10 = smov 0   ;;  %s461_s11 = smov 0  }
   0x6 LB: > { %s249_s12 = sadd.s32 4294967295, %s437_s11   ;;  %s250_s13 = sadd.s32 4294967294, %s437_s11   ;;  %s437_s11 = sphi %s461_s11, %s17_s11   ;;  %s433_s10 = sphi %s459_s10, %s640_s10   ;;  %s429_s9 = sphi %s457_s9, %s639_s9   ;;  %s425_s8 = sphi %s455_s8, %s638_s8   ;;  %s421_s7 = sphi %s453_s7, %s637_s7   ;;  %s417_s6 = sphi %s451_s6, %s636_s6  }
   0x7   : > { %s29_s14 = sadd.s32 1, %s433_s10  ;;  %s38_s15 = sadd.s32 1, %s425_s8 }
   0x8   : > { %p31_p0 = scmp.ge.s32.totalorder %s29_s14, 2  ;;  %p45_p1 = scmp.ne.s32.totalorder %s425_s8, %s421_s7 }
   0x9   : > { %p46_p2 = scmp.eq.s32.totalorder %s437_s11, 0  ;;  %p51_p3 = scmp.ne.s32.totalorder %s421_s7, %s417_s6 }
   0xa   : > { %s642_s14 = smov (%p31_p0, %s29_s14), 0  ;;  %p52_p5 = scmp.eq.s32.totalorder %s249_s12, 0 }
   0xb   : > { %p492_p4 = por %p46_p2, %p45_p1  ;;  %s33_s17 = ssub.s32 %s433_s10, %s642_s14 }
   0xc   : > { %p77_p6 = scmp.eq.s32.totalorder %s249_s12, 1  ;;  %p36_p7 = scmp.eq.s32.totalorder %s33_s17, 0 }
   0xd   : > { %p498_p8 = por %p52_p5, %p51_p3  ;;  %p83_p10 = scmp.eq.s32.totalorder %s250_s13, 1 }
   0xe   : > { %p502_p9 = por %p77_p6, %p45_p1  ;;  %p275_p13 = scmp.lt.s32.totalorder %s437_s11, 2 }
   0xf   : > { %s507_s20 = scalar_select %p36_p7, %s425_s8, %s38_s15  }
  0x10   : > { %s628_s19 = scalar_select %p502_p9, 1, 0 }
  0x11   : > { %p509_p11 = por %p83_p10, %p51_p3  ;;  %s103_s22 = sand.u32 1, %s425_s8  }
  0x12   : > { %s253_s23 = sshll.u32 %s103_s22, 3  ;;  %s254_s24 = sshll.u32 %s433_s10, 7 }
  0x13   : > { %s629_s21 = scalar_select %p509_p11, 1, 0 }
  0x14   : > { %s520_s27 = scalar_lea.hbm %s623_s0, %s254_s24  ;;  %s107_s28 = scalar_lea.vmem [#allocation2], %s253_s23 }
  0x15   : > { %s115_s29 = sshll.u32 %s107_s28, 4  ;;  %p526_p0 = pnand %p275_p13, %p492_p4  ;;  %s522_s29 = int_to_ptr.vmem [resolvable:$true] %s115_s29 }
  0x16   : > { %s104_s2 = scalar_lea.sflag [#allocation3], %s103_s22  ;;  %s325_s3 = scalar_lea.hbm %s520_s27, 128 }
  0x17   : > { %p326_p3 = scmp.ne.s32.totalorder %s520_s27, %s325_s3  ;;  %p327_p5 = pneg %p526_p0 }
  0x18   : > { %s330_s12 = scalar_lea.hbm %s623_s0, 256  ;;  %p331_p4 = scmp.lt.u32.totalorder %s520_s27, %s623_s0 }
  0x19   : > { %p328_p6 = pnand %p327_p5, %p326_p3  ;;  %p332_p10 = scmp.lt.u32.totalorder %s330_s12, %s325_s3 }
  0x1a   : > { %p334_p12 = scmp.lt.u32.totalorder %s325_s3, %s520_s27 }
  0x1b   : > { %p329_p7 = pneg %p328_p6  ;;  %p333_p13 = por %p332_p10, %p331_p4 }
  0x1d   : > { %p335_p1 = por %p334_p12, %p333_p13 }
  0x1f   : > { %p336_p2 = pnand %p335_p1, %p329_p7 }
  0x21   : > { %339 = shalt.err (!%p336_p2)
}
  0x22   : > { %s340_s16 = scalar_lea.vmem %s522_s29, 128  ;;  %s439_s17 = smov [#allocation2]  }
  0x23   : > { %p341_p3 = scmp.ne.s32.totalorder %s522_s29, %s340_s16  ;;  %s345_s22 = sshll.u32 %s439_s17, 4  ;;  %s346_s22 = int_to_ptr.vmem [resolvable:$false] %s345_s22 }
  0x24   : > { %s347_s23 = scalar_lea.vmem %s346_s22, 256  ;;  %p348_p9 = scmp.lt.s32.totalorder %s522_s29, %s346_s22 }
  0x25   : > { %p343_p6 = pnand %p341_p3, %p327_p5  ;;  %p349_p4 = scmp.lt.s32.totalorder %s347_s23, %s340_s16 }
  0x27   : > { %p344_p11 = pneg %p343_p6  ;;  %p350_p10 = por %p349_p4, %p348_p9 }
  0x29   : > { %p351_p12 = pnand %p350_p10, %p344_p11 }
  0x2b   : > { %354 = shalt.err (!%p351_p12)
}
  0x2c   : > { %270 = dma.hbm_to_vmem [thread:$0]  (!%p526_p0), %s520_s27, 128, %s522_s29, %s104_s2  }
  0x2d   : > { %p631_p1 = scmp.lt.s32.totalorder %s437_s11, 3  ;;  %p632_p2 = scmp.ge.s32.totalorder %s437_s11, 1 }
  0x2f   : > { %p121_p5 = pnand %p632_p2, %p631_p1 }
  0x30   : > { %s562_s24 = sand.u32 (!%p121_p5), 1, %s421_s7  }
  0x31   : > { %124 = sbr.rel (%p121_p5) target bundleno = 83 (0x53), region = 24  ;;  %s256_s25 = sshll.u32 (!%p121_p5), %s562_s24, 3 }
  0x32   : > { %s127_s26 = scalar_lea.sflag (!%p121_p5), [#allocation3], %s562_s24  ;;  %s130_s28 = scalar_lea.vmem (!%p121_p5), [#allocation2], %s256_s25 }
  0x38   : > { %408 = dma.done.wait (%p498_p8), %s127_s26, 128  }
  0x39   : > { %410 = vsyncadd (%p498_p8), %s127_s26, 4294967168  ;;  %s148_s27 = scalar_lea.vmem [#allocation5], %s256_s25  ;;  %s260_s30 = sshll.u32 %s429_s9, 7  ;;  %v149_v0 = vld [vmem:[%s130_s28] ss:$2 sm:$0xf] }
  0x3a   : > { %s169_s29 = sshll.u32 %s148_s27, 4  ;;  %s576_s4 = scalar_lea.hbm %s624_s1, %s260_s30  ;;  %v258_v1 = vld [vmem:[%s130_s28 + $0x1] ss:$2 sm:$0xf]  ;;  %150 = vst [vmem:[%s148_s27] sm:$0xf] %v149_v0  ;;  %s571_s29 = int_to_ptr.vmem [resolvable:$true] %s169_s29 }
  0x3b   : > { %153 = vst [vmem:[%s148_s27 + $0x4] sm:$0xf] %v258_v1  ;;  %s155_s18 = scalar_lea.sflag [#allocation4], %s562_s24  ;;  %s355_s5 = scalar_lea.vmem %s571_s29, 128 }
  0x3c   : > { %p356_p8 = scmp.ne.s32.totalorder %s571_s29, %s355_s5  ;;  %p633_p9 = scmp.ne.s32.totalorder %s628_s19, 0 }
  0x3d   : > { %s440_s9 = smov [#allocation5]  }
  0x3e   : > { %p357_p11 = pnand %p356_p8, %p633_p9  ;;  %s359_s12 = sshll.u32 %s440_s9, 4  ;;  %s360_s12 = int_to_ptr.vmem [resolvable:$false] %s359_s12 }
  0x3f   : > { %s361_s13 = scalar_lea.vmem %s360_s12, 256  ;;  %p362_p7 = scmp.lt.s32.totalorder %s571_s29, %s360_s12 }
  0x40   : > { %p358_p0 = pneg %p357_p11  ;;  %p363_p13 = scmp.lt.s32.totalorder %s361_s13, %s355_s5 }
  0x42   : > { %p364_p3 = por %p363_p13, %p362_p7 }
  0x44   : > { %p365_p6 = pnand %p364_p3, %p358_p0 }
  0x46   : > { %368 = shalt.err (!%p365_p6)
}
  0x47   : > { %s369_s15 = scalar_lea.hbm %s576_s4, 128  ;;  %s373_s22 = scalar_lea.hbm %s624_s1, 256 }
  0x48   : > { %p370_p4 = scmp.ne.s32.totalorder %s576_s4, %s369_s15  ;;  %p374_p1 = scmp.lt.u32.totalorder %s576_s4, %s624_s1 }
  0x49   : > { %p375_p2 = scmp.lt.u32.totalorder %s373_s22, %s369_s15  ;;  %p377_p8 = scmp.lt.u32.totalorder %s369_s15, %s576_s4 }
  0x4a   : > { %p371_p10 = pnand %p370_p4, %p633_p9 }
  0x4b   : > { %p376_p5 = por %p375_p2, %p374_p1 }
  0x4c   : > { %p372_p12 = pneg %p371_p10 }
  0x4d   : > { %p378_p11 = por %p377_p8, %p376_p5 }
  0x4f   : > { %p379_p0 = pnand %p378_p11, %p372_p12 }
  0x51   : > { %382 = shalt.err (!%p379_p0)
}
  0x52   : > { %265 = dma.vmem_to_hbm [thread:$0]  (%p633_p9), %s571_s29, 128, %s576_s4, %s155_s18  }
  0x53 PF: > { %s181_s25 = sand.u32 1, %s417_s6   ;;  %p634_p7 = scmp.ne.s32.totalorder %s629_s21, 0 }
  0x54   : > { %p635_p13 = scmp.ge.s32.totalorder %s437_s11, 2  ;;  %s182_s26 = scalar_lea.sflag [#allocation4], %s181_s25 }
  0x56   : > { %p272_p3 = pnand %p635_p13, %p634_p7 }
  0x58   : > { %412 = dma.done.wait (!%p272_p3), %s182_s26, 128  }
  0x59   : > { %414 = vsyncadd (!%p272_p3), %s182_s26, 4294967168  ;;  %s17_s11 = sadd.s32 1, %s437_s11   ;;  %s636_s6 = smov %s421_s7 }
  0x5a   : > { %p14_p6 = scmp.ge.s32.totalorder %s17_s11, 4   ;;  %s637_s7 = smov %s425_s8 }
  0x5b   : > { %s638_s8 = smov %s507_s20  ;;  %s639_s9 = smov %s433_s10 }
  0x5c   : > { %s640_s10 = smov %s642_s14  ;;  %16 = sbr.rel (!%p14_p6) target bundleno = 6 (0x6), region = 70 }
  0x63   :  { %187 = vsyncpa [#allocation3], 1 }
  0x64   :  { %189 = vsyncpa [#allocation3 + $0x1], 1 }
  0x65   :  { %190 = vsyncpa [#allocation4], 1 }
  0x66   :  { %192 = vsyncpa [#allocation4 + $0x1], 1 }

</bundles_post_ra>
